<compile_context>
chip_gen: v7x
topology: tpu7x:2x2x1
jax: 0.10.0
libtpu: 0.0.40
codegen_flags: <defaults>
</compile_context>

<pallas_src>
import functools

import jax
import jax.numpy as jnp
from jax import lax
from jax.experimental import pallas as pl
from jax.experimental.pallas import tpu as pltpu


def _ce_kernel(x_ref, tgt_ref, out_ref, *, n_valid, n_classes, epsilon, tm):
    i = pl.program_id(0)

    @pl.when(i == 0)
    def _():
        out_ref[...] = jnp.zeros_like(out_ref)

    x = x_ref[...].astype(jnp.float32)          # (tm, C) f32
    tgt = tgt_ref[...]                          # (tm, 1) int32

    # Numerically stable log-sum-exp per row (lane reductions + EUP exp/log).
    row_max = jnp.max(x, axis=-1, keepdims=True)                          # (tm, 1)
    lse = row_max + jnp.log(jnp.sum(jnp.exp(x - row_max), axis=-1, keepdims=True))

    # x[row, target[row]] via one-hot compare/select + lane reduce (no gather).
    lane = lax.broadcasted_iota(jnp.int32, x.shape, 1)                    # (tm, C)
    x_tgt = jnp.sum(jnp.where(lane == tgt, x, 0.0), axis=-1, keepdims=True)

    mean_x = jnp.sum(x, axis=-1, keepdims=True) * (1.0 / n_classes)       # (tm, 1)

    # (1-eps)*(lse - x_tgt) + eps*(lse - mean_x) == lse - (1-eps)*x_tgt - eps*mean_x
    per_row = lse - (1.0 - epsilon) * x_tgt - epsilon * mean_x            # (tm, 1)

    # Mask rows belonging to the ragged last tile's padding (undefined data).
    row_idx = lax.broadcasted_iota(jnp.int32, per_row.shape, 0) + i * tm
    per_row = jnp.where(row_idx < n_valid, per_row, 0.0)

    # Per-tile partial sum -> resident (1, 1) accumulator.
    out_ref[...] += jnp.sum(per_row, axis=0, keepdims=True)

    @pl.when(i == pl.num_programs(0) - 1)
    def _():
        out_ref[...] = out_ref[...] * (1.0 / n_valid)


def cross_entropy_label_smoothing(x, target, *, epsilon=0.1, tm=512,
                                  vmem_budget_bytes=8 << 20):
    """Label-smoothed cross entropy (mean over batch) via a Pallas TPU kernel.

    x: (N, C) logits (f32 or bf16), target: (N,) int class indices.
    """
    N, C = x.shape
    itemsize = jnp.dtype(x.dtype).itemsize

    def round_up(a, m):
        return ((a + m - 1) // m) * m

    # Row tile: as big as possible (amortize the ~0.35us per-grid-step
    # overhead), but (a) the double-buffered logits tile must fit the VMEM
    # budget and (b) never exceed the 8-rounded batch so tiny batches don't
    # pay for padded compute.
    tm_fit = max(8, (vmem_budget_bytes // (2 * C * itemsize)) // 8 * 8)
    tm = int(max(8, min(tm, tm_fit, round_up(N, 8))))

    grid = pl.cdiv(N, tm)                       # ragged last tile is masked
    tgt2d = target.astype(jnp.int32).reshape(N, 1)

    kernel = functools.partial(
        _ce_kernel, n_valid=N, n_classes=C, epsilon=float(epsilon), tm=tm)

    out = pl.pallas_call(
        kernel,
        out_shape=jax.ShapeDtypeStruct((1, 1), jnp.float32),
        grid_spec=pltpu.PrefetchScalarGridSpec(
            num_scalar_prefetch=0,
            grid=(grid,),
            in_specs=[
                pl.BlockSpec((tm, C), lambda i: (i, 0)),   # logits row tile
                pl.BlockSpec((tm, 1), lambda i: (i, 0)),   # targets row tile
            ],
            out_specs=pl.BlockSpec((1, 1), lambda i: (0, 0)),
        ),
        compiler_params=pltpu.CompilerParams(
            dimension_semantics=("arbitrary",)),   # grid axis is a reduction
    )(x, tgt2d)
    return out[0, 0]


def _reference(x, target, epsilon):
    logp = jax.nn.log_softmax(x.astype(jnp.float32), axis=-1)
    nll = -jnp.take_along_axis(logp, target[:, None].astype(jnp.int32), axis=-1)[:, 0]
    return ((1.0 - epsilon) * nll + epsilon * (-logp.mean(axis=-1))).mean()


if __name__ == "__main__":
    eps = 0.1
    key = jax.random.PRNGKey(0)
    kx, kt, kx2, kt2 = jax.random.split(key, 4)

    # Shapes implied by the module: logits (batch, classes), int targets (batch,).
    N, C = 8, 32
    x = jax.random.normal(kx, (N, C), dtype=jnp.float32)
    target = jax.random.randint(kt, (N,), 0, C, dtype=jnp.int32)

    loss = jax.block_until_ready(
        cross_entropy_label_smoothing(x, target, epsilon=eps))
    ref = _reference(x, target, eps)
    assert loss.shape == (), loss.shape
    assert jnp.allclose(loss, ref, atol=1e-5, rtol=1e-5), (float(loss), float(ref))

    # Second case: multi-step grid accumulation + ragged (masked) last tile,
    # with no wrapper-side padding copy of the logits.
    N2, C2 = 300, 96
    x2 = jax.random.normal(kx2, (N2, C2), dtype=jnp.float32)
    target2 = jax.random.randint(kt2, (N2,), 0, C2, dtype=jnp.int32)
    loss2 = jax.block_until_ready(
        cross_entropy_label_smoothing(x2, target2, epsilon=eps, tm=128))
    ref2 = _reference(x2, target2, eps)
    assert jnp.allclose(loss2, ref2, atol=1e-4, rtol=1e-4), (float(loss2), float(ref2))

    # Third case: bf16 logits take the native-dtype DMA path (cast in-kernel).
    x3 = x2.astype(jnp.bfloat16)
    loss3 = jax.block_until_ready(
        cross_entropy_label_smoothing(x3, target2, epsilon=eps))
    ref3 = _reference(x3, target2, eps)
    assert jnp.allclose(loss3, ref3, atol=1e-2, rtol=1e-2), (float(loss3), float(ref3))

    print("KERNEL_OK")
</pallas_src>

<mosaic_0001>
module attributes {stable_mosaic.version = 11 : i64} {
  func.func @_ce_kernel(%arg0: i32, %arg1: memref<8x32xf32, #tpu.memory_space<vmem>>, %arg2: memref<8x1xi32, #tpu.memory_space<vmem>>, %arg3: memref<1x1xf32, #tpu.memory_space<vmem>>) attributes {dimension_semantics = [#tpu.dimension_semantics<arbitrary>], iteration_bounds = array<i64: 1>, scalar_prefetch = 0 : i64, scratch_operands = 0 : i64, tpu.core_type = #tpu.core_type<tc>, window_params = [{transform_indices = @transform_0, window_bounds = array<i64: 8, 32>}, {transform_indices = @transform_1, window_bounds = array<i64: 8, 1>}, {pipeline_mode = #tpu.pipeline_mode<synchronous>, transform_indices = @transform_2, window_bounds = array<i64: 1, 1>}]} {
    %c0_i32 = arith.constant 0 : i32
    %0 = arith.cmpi eq, %arg0, %c0_i32 : i32
    %1 = arith.extui %0 : i1 to i32
    %c0_i32_0 = arith.constant 0 : i32
    %2 = arith.cmpi ne, %1, %c0_i32_0 : i32
    scf.if %2 {
      %cst_20 = arith.constant 0.000000e+00 : f32
      %47 = vector.broadcast %cst_20 : f32 to vector<1x1xf32>
      %c0_21 = arith.constant 0 : index
      %c0_22 = arith.constant 0 : index
      %48 = vector.load %arg3[%c0_21, %c0_22] : memref<1x1xf32, #tpu.memory_space<vmem>>, vector<1x1xf32>
      tpu.vector_store %arg3[%c0_21, %c0_22], %47 {strides = array<i32>} : memref<1x1xf32, #tpu.memory_space<vmem>>, vector<1x1xf32>,
    } else {
    }
    %c0 = arith.constant 0 : index
    %c0_1 = arith.constant 0 : index
    %3 = vector.load %arg1[%c0, %c0_1] : memref<8x32xf32, #tpu.memory_space<vmem>>, vector<8x32xf32>
    %c0_2 = arith.constant 0 : index
    %c0_3 = arith.constant 0 : index
    %4 = vector.load %arg2[%c0_2, %c0_3] : memref<8x1xi32, #tpu.memory_space<vmem>>, vector<8x1xi32>
    %cst = arith.constant dense<0xFF800000> : vector<8xf32>
    %5 = vector.multi_reduction <maximumf>, %3, %cst [1] : vector<8x32xf32> to vector<8xf32>
    %6 = vector.shape_cast %5 : vector<8xf32> to vector<8x1xf32>
    %7 = vector.broadcast %6 : vector<8x1xf32> to vector<8x32xf32>
    %8 = arith.subf %3, %7 : vector<8x32xf32>
    %9 = math.exp %8 : vector<8x32xf32>
    %cst_4 = arith.constant dense<0.000000e+00> : vector<8xf32>
    %10 = vector.multi_reduction <add>, %9, %cst_4 [1] : vector<8x32xf32> to vector<8xf32>
    %11 = vector.shape_cast %10 : vector<8xf32> to vector<8x1xf32>
    %12 = math.log %11 : vector<8x1xf32>
    %13 = arith.addf %6, %12 : vector<8x1xf32>
    %14 = tpu.iota {dimensions = array<i32: 1>} : vector<8x32xi32>
    %15 = vector.broadcast %4 : vector<8x1xi32> to vector<8x32xi32>
    %16 = arith.cmpi eq, %14, %15 : vector<8x32xi32>
    %cst_5 = arith.constant 0.000000e+00 : f32
    %17 = vector.broadcast %cst_5 : f32 to vector<8x32xf32>
    %18 = arith.select %16, %3, %17 : vector<8x32xi1>, vector<8x32xf32>
    %cst_6 = arith.constant dense<0.000000e+00> : vector<8xf32>
    %19 = vector.multi_reduction <add>, %18, %cst_6 [1] : vector<8x32xf32> to vector<8xf32>
    %20 = vector.shape_cast %19 : vector<8xf32> to vector<8x1xf32>
    %cst_7 = arith.constant dense<0.000000e+00> : vector<8xf32>
    %21 = vector.multi_reduction <add>, %3, %cst_7 [1] : vector<8x32xf32> to vector<8xf32>
    %22 = vector.shape_cast %21 : vector<8xf32> to vector<8x1xf32>
    %cst_8 = arith.constant 3.125000e-02 : f32
    %23 = vector.broadcast %cst_8 : f32 to vector<8x1xf32>
    %24 = arith.mulf %22, %23 : vector<8x1xf32>
    %cst_9 = arith.constant 0.899999976 : f32
    %25 = vector.broadcast %cst_9 : f32 to vector<8x1xf32>
    %26 = arith.mulf %25, %20 : vector<8x1xf32>
    %27 = arith.subf %13, %26 : vector<8x1xf32>
    %cst_10 = arith.constant 1.000000e-01 : f32
    %28 = vector.broadcast %cst_10 : f32 to vector<8x1xf32>
    %29 = arith.mulf %28, %24 : vector<8x1xf32>
    %30 = arith.subf %27, %29 : vector<8x1xf32>
    %31 = tpu.iota {dimensions = array<i32: 0>} : vector<8x1xi32>
    %c8_i32 = arith.constant 8 : i32
    %32 = arith.muli %arg0, %c8_i32 : i32
    %33 = vector.broadcast %32 : i32 to vector<8x1xi32>
    %34 = arith.addi %31, %33 : vector<8x1xi32>
    %c8_i32_11 = arith.constant 8 : i32
    %35 = vector.broadcast %c8_i32_11 : i32 to vector<8x1xi32>
    %36 = arith.cmpi slt, %34, %35 : vector<8x1xi32>
    %cst_12 = arith.constant 0.000000e+00 : f32
    %37 = vector.broadcast %cst_12 : f32 to vector<8x1xf32>
    %38 = arith.select %36, %30, %37 : vector<8x1xi1>, vector<8x1xf32>
    %c0_13 = arith.constant 0 : index
    %c0_14 = arith.constant 0 : index
    %39 = vector.load %arg3[%c0_13, %c0_14] : memref<1x1xf32, #tpu.memory_space<vmem>>, vector<1x1xf32>
    %cst_15 = arith.constant dense<0.000000e+00> : vector<1xf32>
    %40 = vector.multi_reduction <add>, %38, %cst_15 [0] : vector<8x1xf32> to vector<1xf32>
    %41 = vector.shape_cast %40 : vector<1xf32> to vector<1x1xf32>
    %42 = arith.addf %39, %41 : vector<1x1xf32>
    %c0_16 = arith.constant 0 : index
    %c0_17 = arith.constant 0 : index
    %43 = vector.load %arg3[%c0_16, %c0_17] : memref<1x1xf32, #tpu.memory_space<vmem>>, vector<1x1xf32>
    tpu.vector_store %arg3[%c0_16, %c0_17], %42 {strides = array<i32>} : memref<1x1xf32, #tpu.memory_space<vmem>>, vector<1x1xf32>,
    %c0_i32_18 = arith.constant 0 : i32
    %44 = arith.cmpi eq, %arg0, %c0_i32_18 : i32
    %45 = arith.extui %44 : i1 to i32
    %c0_i32_19 = arith.constant 0 : i32
    %46 = arith.cmpi ne, %45, %c0_i32_19 : i32
    scf.if %46 {
      %c0_20 = arith.constant 0 : index
      %c0_21 = arith.constant 0 : index
      %47 = vector.load %arg3[%c0_20, %c0_21] : memref<1x1xf32, #tpu.memory_space<vmem>>, vector<1x1xf32>
      %cst_22 = arith.constant 1.250000e-01 : f32
      %48 = vector.broadcast %cst_22 : f32 to vector<1x1xf32>
      %49 = arith.mulf %47, %48 : vector<1x1xf32>
      %c0_23 = arith.constant 0 : index
      %c0_24 = arith.constant 0 : index
      %50 = vector.load %arg3[%c0_23, %c0_24] : memref<1x1xf32, #tpu.memory_space<vmem>>, vector<1x1xf32>
      tpu.vector_store %arg3[%c0_23, %c0_24], %49 {strides = array<i32>} : memref<1x1xf32, #tpu.memory_space<vmem>>, vector<1x1xf32>,
    } else {
    }
    return
  }
  func.func @transform_0(%arg0: i32) -> (i32, i32) {
    %c0_i32 = arith.constant 0 : i32
    %c0_i32_0 = arith.constant 0 : i32
    return %arg0, %c0_i32 : i32, i32
  }
  func.func @transform_1(%arg0: i32) -> (i32, i32) {
    %c0_i32 = arith.constant 0 : i32
    %c0_i32_0 = arith.constant 0 : i32
    return %arg0, %c0_i32 : i32, i32
  }
  func.func @transform_2(%arg0: i32) -> (i32, i32) {
    %c0_i32 = arith.constant 0 : i32
    %c0_i32_0 = arith.constant 0 : i32
    %c0_i32_1 = arith.constant 0 : i32
    return %c0_i32, %c0_i32_0 : i32, i32
  }
}

</mosaic_0001>

<bundles_post_ra>
// kernel: tpu_custom_call.1
= control target key start
LH: loop header
LB: loop body
LE: loop exit
PB: predicated region body
PF: predicated region fallthrough
CT: control target
= control target key end

     0   :  { %vm20_vm0 = vcmask 261120   ;;  %s163_s0 = inlined_call_operand.vmem [shape: f32[8,32], index: 0, kind: input, shape index: {}]   ;;  %s164_s1 = inlined_call_operand.vmem [shape: s32[8,1], index: 1, kind: input, shape index: {}]   ;;  %s165_s2 = inlined_call_operand.hbm [shape: f32[1,1], index: 2, kind: output, shape index: {}]  }
   0x1   :  { %v18_v0 = vld [vmem:[%s163_s0] sm:$0xff] }
   0x2   :  { %7 = vsyncpa [#allocation3], 0  ;;  %v21_v1 = vsel %vm20_vm0, %v18_v0, -inf  ;;  %v120_v2 = vmov 0   ;;  %v19_v3 = vld [vmem:[%s164_s1] sm:$0xff]  ;;  %v33_v7 = vlaneseq  ;;  %v43_v14 = vsel %vm20_vm0, %v18_v0, 0.0 }
   0x3   :  { %91 = vset.pattern.permute.xlu0 %v120_v2  ;;  %vm16_vm2 = vcmask 0   ;;  %v121_v15 = vmov 0.0   ;;  %s122_s0 = smov [#allocation2]  }
   0x4   :  { %22 = vmax.xlane.f32.xlu0 %v21_v1  ;;  %v34_v8 = vand.u32 127, %v33_v7  ;;  %17 = vst.msk [vmem:[#allocation2] sm:$0x1] %vm16_vm2, %v121_v15  ;;  %s80_s1 = sshll.u32 %s122_s0, 4  ;;  %s81_s1 = int_to_ptr.vmem [resolvable:$true] %s80_s1 }
   0x5   :  { %s96_s13 = scalar_lea.vmem %s81_s1, 16  ;;  %s100_s14 = scalar_lea.vmem %s81_s1, 32 }
   0x6   :  { %p97_p0 = scmp.ne.s32.totalorder %s81_s1, %s96_s13  ;;  %p101_p1 = scmp.lt.s32.totalorder %s81_s1, %s81_s1 }
   0x7   :  { %p102_p2 = scmp.lt.s32.totalorder %s100_s14, %s96_s13 }
   0x9   :  { %p103_p3 = por %p102_p2, %p101_p1 }
   0xb   :  { %v58_v32 = vld [vmem:[#allocation2] sm:$0x1]  ;;  %p104_p4 = pnand %p103_p3, %p97_p0 }
  0x1a   :  { %36 = vperm.xlu0 %91, %v19_v3  }
  0x91   :  { %v23_v4 = vpop.xlane.xlu0 %22 }
  0x92   :  { %v24_v5 = vsub.f32 %v18_v0, %v23_v4 }
  0x94   :  { %v25_v6 = vmul.f32 1.442695, %v24_v5 }
  0x96   :  { %92 = vpow2.f32 %v25_v6 }
  0x99   :  { %v37_v9 = vpop.permute.xlu0 %36 }
  0x9a   :  { %vm38_vm1 = vcmp.eq.s32.totalorder %v34_v8, %v37_v9 }
  0x9b   :  { %v39_v11 = vsel %vm38_vm1, %v18_v0, 0.0 }
  0x9c   :  { %v40_v13 = vsel %vm20_vm0, %v39_v11, 0.0 }
  0xa0   :  { %v93_v10 = vpop.eup %92 }
  0xa1   :  { %v27_v12 = vsel %vm20_vm0, %v93_v10, 0.0 }
  0xa2   :  { %28 = vadd.xlane.f32.xlu1 %v27_v12 }
  0xa6   :  { %41 = vadd.xlane.f32.xlu1 %v40_v13 }
  0xaa   :  { %44 = vadd.xlane.f32.xlu1 %v43_v14 }
 0x12f   :  { %v29_v16 = vpop.xlane.xlu1 %28 }
 0x130   :  { %94 = vlog2.f32 %v29_v16 }
 0x133   :  { %v42_v17 = vpop.xlane.xlu1 %41 }
 0x134   :  { %v47_v23 = vmul.f32 0.9, %v42_v17 }
 0x137   :  { %v45_v18 = vpop.xlane.xlu1 %44 }
 0x138   :  { %v46_v19 = vmul.f32 0.03125, %v45_v18 }
 0x13a   :  { %v95_v20 = vpop.eup %94  ;;  %v49_v24 = vmul.f32 0.1, %v46_v19 }
 0x13b   :  { %v31_v21 = vmul.f32 0.6931472, %v95_v20 }
 0x13d   :  { %v32_v22 = vadd.f32 %v31_v21, %v23_v4 }
 0x13f   :  { %v48_v25 = vsub.f32 %v32_v22, %v47_v23 }
 0x141   :  { %v50_v26 = vsub.f32 %v48_v25, %v49_v24 }
 0x143   :  { %v59_v27 = vrot.slane %v50_v26, 4 }
 0x145   :  { %v60_v28 = vadd.f32 %v59_v27, %v50_v26 }
 0x147   :  { %v61_v29 = vrot.slane %v60_v28, 2 }
 0x149   :  { %v62_v30 = vadd.f32 %v61_v29, %v60_v28 }
 0x14b   :  { %v63_v31 = vrot.slane %v62_v30, 1 }
 0x14d   :  { %v64_v33 = vadd.f32 %v63_v31, %v62_v30 }
 0x14f   :  { %v65_v34 = vadd.f32 %v64_v33, %v58_v32 }
 0x151   :  { %67 = vst.msk [vmem:[#allocation2] sm:$0x1] %vm16_vm2, %v65_v34 }
 0x158   :  { %v71_v35 = vld [vmem:[#allocation2] sm:$0x1] }
 0x159   :  { %v72_v36 = vmul.f32 0.125, %v71_v35 }
 0x15b   :  { %73 = vst.msk [vmem:[#allocation2] sm:$0x1] %vm16_vm2, %v72_v36 }
 0x15c   :  { %107 = shalt.err (!%p104_p4)
}
 0x15d   :  { %s108_s17 = scalar_lea.hbm %s165_s2, 16 }
 0x15e   :  { %p109_p5 = scmp.ne.s32.totalorder %s165_s2, %s108_s17  ;;  %p112_p6 = scmp.lt.u32.totalorder %s108_s17, %s165_s2 }
 0x160   :  { %p114_p7 = pnand %p112_p6, %p109_p5 }
 0x162   :  { %117 = shalt.err (!%p114_p7)
}
 0x163   :  { %83 = dma.vmem_to_hbm [thread:$0]  %s81_s1, 16, %s165_s2, [#allocation3]  }
 0x164   :  { %118 = dma.done.wait [#allocation3], 16  }
 0x165   :  { %119 = vsyncadd [#allocation3], 4294967280 }
 0x166   :  { %87 = vsyncpa [#allocation3], 1 }

</bundles_post_ra>
